<compile_context>
chip_gen: v7x
topology: tpu7x:2x2x1
jax: 0.10.0
libtpu: 0.0.40
codegen_flags: <defaults>
</compile_context>

<pallas_src>
import math

import jax
import jax.numpy as jnp
from jax.experimental import pallas as pl
from jax.experimental.pallas import tpu as pltpu


_LANES = 128


# ----------------------------------------------------------------------------
# Glue: Bernstein basis matrix (equivalent of bezierM / Mtk / nChoosek)
# ----------------------------------------------------------------------------
def _nchoosek(n, k):
    return float(math.comb(n, k))


def bezier_m(t, n):
    """t: (B, T) sample parameters in [0,1]. Returns (B, T, n+1) Bernstein matrix."""
    cols = [
        jnp.power(t, k) * jnp.power(1.0 - t, n - k) * _nchoosek(n, k)
        for k in range(n + 1)
    ]
    return jnp.stack(cols, axis=2)  # (B, T, n+1)


# ----------------------------------------------------------------------------
# Pallas kernel: out_t[d, n] = sum_k P[k, d] * M_t[k, n]
# ----------------------------------------------------------------------------
def _bezier_forward_kernel(p_ref, m_ref, o_ref):
    # p_ref: (K, D) control points in SMEM  (scalar reads)
    # m_ref: (K, TN) Bernstein tile in VMEM (lane-dense, K on sublanes)
    # o_ref: (D, TN) output tile in VMEM    (lane-dense)
    k_dim = m_ref.shape[0]
    d_dim = o_ref.shape[0]
    # Fully unrolled K*D scalar x vector FMAs on the VPU; no MXU involvement.
    for d in range(d_dim):
        acc = p_ref[0, d] * m_ref[0:1, :]                  # (1, TN)
        for k in range(1, k_dim):
            acc = acc + p_ref[k, d] * m_ref[k:k + 1, :]
        o_ref[d:d + 1, :] = acc


def bezier_curve_forward(M, control_points, *, tile_n=None):
    """M: (B, T, K) float32, control_points: (K, D) float32 -> (B, T, D)."""
    B, T, K = M.shape
    K2, D = control_points.shape
    assert K == K2, f"M has {K} control-point columns but got {K2} control points"

    N = B * T
    # Lane-dense layout: flattened rows of M go on the lane (last) axis.
    m_t = jnp.transpose(M.reshape(N, K))  # (K, N)

    # Pad N up to a lane multiple, then to a tile multiple.
    n_pad = pl.cdiv(N, _LANES) * _LANES
    if tile_n is None:
        # (K + D) * 4 B per column; 64K columns ~= 3 MiB per buffer pair, well
        # under the 32 MiB scoped-VMEM default even on v7x (64 MiB physical).
        tile_n = min(n_pad, 512 * _LANES)
    n_pad = pl.cdiv(n_pad, tile_n) * tile_n
    if n_pad != N:
        m_t = jnp.pad(m_t, ((0, 0), (0, n_pad - N)))
    grid_n = n_pad // tile_n  # == 1 at small N -> no per-step grid overhead

    out_t = pl.pallas_call(
        _bezier_forward_kernel,
        out_shape=jax.ShapeDtypeStruct((D, n_pad), M.dtype),
        grid_spec=pltpu.PrefetchScalarGridSpec(
            num_scalar_prefetch=0,
            grid=(grid_n,),
            in_specs=[
                # Small (K, D) control-point table lives whole in SMEM.
                pl.BlockSpec(memory_space=pltpu.MemorySpace.SMEM),
                # Lane-dense (K, tile_n) slab of M^T per grid step.
                pl.BlockSpec((K, tile_n), lambda i: (0, i)),
            ],
            out_specs=pl.BlockSpec((D, tile_n), lambda i: (0, i)),
        ),
        compiler_params=pltpu.CompilerParams(
            dimension_semantics=("parallel",),
        ),
        cost_estimate=pl.CostEstimate(
            flops=2 * N * K * D,
            transcendentals=0,
            bytes_accessed=4 * (N * K + N * D + K * D),
        ),
    )(control_points, m_t)

    # Strip padding and return in the PyTorch (B, T, D) convention.
    return jnp.transpose(out_t[:, :N]).reshape(B, T, D)


# ----------------------------------------------------------------------------
# Module-equivalent wrapper
# ----------------------------------------------------------------------------
class BezierCurveModule:
    """JAX/Pallas equivalent of the PyTorch BezierCurveModule (forward only)."""

    def __init__(self, control_points, mask=None):
        # control_points: (K, D). The PyTorch `mask` only gates gradients
        # (requires_grad per control point); it has no effect on forward.
        self.control_points = jnp.asarray(control_points, dtype=jnp.float32)
        if mask is None:
            self.mask = [True] * self.control_points.shape[0]
        else:
            self.mask = mask

    def all_control_points(self):
        # (1, K, D) — mirrors torch.stack(...).unsqueeze(0)
        return self.control_points[None, ...]

    def forward(self, M):
        # PyTorch: torch.matmul(M, points) with points (1, K, D) broadcast over B.
        return bezier_curve_forward(M, self.control_points)

    __call__ = forward


# ----------------------------------------------------------------------------
# Main
# ----------------------------------------------------------------------------
if __name__ == "__main__":
    key = jax.random.PRNGKey(0)
    k_cp, _ = jax.random.split(key)

    # Small, module-consistent shapes:
    batch = 2          # B
    num_samples = 16   # T   (points along the curve)
    degree = 7         # n   -> K = n + 1 = 8 control points
    dim = 2            # D   (2-D curve, as in deepracing)
    num_cp = degree + 1

    # Deterministic synthetic control points (no checkpoint).
    control_points = jax.random.normal(k_cp, (num_cp, dim), dtype=jnp.float32)

    # Sample parameters t in [0, 1] per batch element, then the Bernstein matrix M.
    t = jnp.tile(jnp.linspace(0.0, 1.0, num_samples, dtype=jnp.float32)[None, :],
                 (batch, 1))
    M = bezier_m(t, degree)  # (B, T, K) float32

    module = BezierCurveModule(control_points)
    out = module(M)  # (B, T, D)
    out = jax.block_until_ready(out)

    # Sanity check against plain-JAX reference (same math as torch.matmul broadcast).
    ref = jnp.matmul(M, module.all_control_points())
    assert out.shape == (batch, num_samples, dim), out.shape
    assert jnp.allclose(out, ref, atol=1e-5, rtol=1e-5), "mismatch vs reference"

    print("KERNEL_OK")
</pallas_src>

<mosaic_0001>
module attributes {stable_mosaic.version = 11 : i64} {
  func.func @_bezier_forward_kernel(%arg0: i32, %arg1: memref<8x2xf32, #tpu.memory_space<smem>>, %arg2: memref<8x128xf32, #tpu.memory_space<vmem>>, %arg3: memref<2x128xf32, #tpu.memory_space<vmem>>) attributes {dimension_semantics = [#tpu.dimension_semantics<parallel>], iteration_bounds = array<i64: 1>, scalar_prefetch = 0 : i64, scratch_operands = 0 : i64, tpu.core_type = #tpu.core_type<tc>, window_params = [{transform_indices = @transform_0, window_bounds = array<i64: 8, 2>}, {transform_indices = @transform_1, window_bounds = array<i64: 8, 128>}, {transform_indices = @transform_2, window_bounds = array<i64: 2, 128>}]} {
    %c0 = arith.constant 0 : index
    %c0_0 = arith.constant 0 : index
    %0 = memref.load %arg1[%c0, %c0_0] : memref<8x2xf32, #tpu.memory_space<smem>>
    %c0_1 = arith.constant 0 : index
    %c0_2 = arith.constant 0 : index
    %1 = vector.load %arg2[%c0_1, %c0_2] : memref<8x128xf32, #tpu.memory_space<vmem>>, vector<1x128xf32>
    %2 = vector.broadcast %0 : f32 to vector<1x128xf32>
    %3 = arith.mulf %2, %1 : vector<1x128xf32>
    %c1 = arith.constant 1 : index
    %c0_3 = arith.constant 0 : index
    %4 = memref.load %arg1[%c1, %c0_3] : memref<8x2xf32, #tpu.memory_space<smem>>
    %c1_4 = arith.constant 1 : index
    %c0_5 = arith.constant 0 : index
    %5 = vector.load %arg2[%c1_4, %c0_5] : memref<8x128xf32, #tpu.memory_space<vmem>>, vector<1x128xf32>
    %6 = vector.broadcast %4 : f32 to vector<1x128xf32>
    %7 = arith.mulf %6, %5 : vector<1x128xf32>
    %8 = arith.addf %3, %7 : vector<1x128xf32>
    %c2 = arith.constant 2 : index
    %c0_6 = arith.constant 0 : index
    %9 = memref.load %arg1[%c2, %c0_6] : memref<8x2xf32, #tpu.memory_space<smem>>
    %c2_7 = arith.constant 2 : index
    %c0_8 = arith.constant 0 : index
    %10 = vector.load %arg2[%c2_7, %c0_8] : memref<8x128xf32, #tpu.memory_space<vmem>>, vector<1x128xf32>
    %11 = vector.broadcast %9 : f32 to vector<1x128xf32>
    %12 = arith.mulf %11, %10 : vector<1x128xf32>
    %13 = arith.addf %8, %12 : vector<1x128xf32>
    %c3 = arith.constant 3 : index
    %c0_9 = arith.constant 0 : index
    %14 = memref.load %arg1[%c3, %c0_9] : memref<8x2xf32, #tpu.memory_space<smem>>
    %c3_10 = arith.constant 3 : index
    %c0_11 = arith.constant 0 : index
    %15 = vector.load %arg2[%c3_10, %c0_11] : memref<8x128xf32, #tpu.memory_space<vmem>>, vector<1x128xf32>
    %16 = vector.broadcast %14 : f32 to vector<1x128xf32>
    %17 = arith.mulf %16, %15 : vector<1x128xf32>
    %18 = arith.addf %13, %17 : vector<1x128xf32>
    %c4 = arith.constant 4 : index
    %c0_12 = arith.constant 0 : index
    %19 = memref.load %arg1[%c4, %c0_12] : memref<8x2xf32, #tpu.memory_space<smem>>
    %c4_13 = arith.constant 4 : index
    %c0_14 = arith.constant 0 : index
    %20 = vector.load %arg2[%c4_13, %c0_14] : memref<8x128xf32, #tpu.memory_space<vmem>>, vector<1x128xf32>
    %21 = vector.broadcast %19 : f32 to vector<1x128xf32>
    %22 = arith.mulf %21, %20 : vector<1x128xf32>
    %23 = arith.addf %18, %22 : vector<1x128xf32>
    %c5 = arith.constant 5 : index
    %c0_15 = arith.constant 0 : index
    %24 = memref.load %arg1[%c5, %c0_15] : memref<8x2xf32, #tpu.memory_space<smem>>
    %c5_16 = arith.constant 5 : index
    %c0_17 = arith.constant 0 : index
    %25 = vector.load %arg2[%c5_16, %c0_17] : memref<8x128xf32, #tpu.memory_space<vmem>>, vector<1x128xf32>
    %26 = vector.broadcast %24 : f32 to vector<1x128xf32>
    %27 = arith.mulf %26, %25 : vector<1x128xf32>
    %28 = arith.addf %23, %27 : vector<1x128xf32>
    %c6 = arith.constant 6 : index
    %c0_18 = arith.constant 0 : index
    %29 = memref.load %arg1[%c6, %c0_18] : memref<8x2xf32, #tpu.memory_space<smem>>
    %c6_19 = arith.constant 6 : index
    %c0_20 = arith.constant 0 : index
    %30 = vector.load %arg2[%c6_19, %c0_20] : memref<8x128xf32, #tpu.memory_space<vmem>>, vector<1x128xf32>
    %31 = vector.broadcast %29 : f32 to vector<1x128xf32>
    %32 = arith.mulf %31, %30 : vector<1x128xf32>
    %33 = arith.addf %28, %32 : vector<1x128xf32>
    %c7 = arith.constant 7 : index
    %c0_21 = arith.constant 0 : index
    %34 = memref.load %arg1[%c7, %c0_21] : memref<8x2xf32, #tpu.memory_space<smem>>
    %c7_22 = arith.constant 7 : index
    %c0_23 = arith.constant 0 : index
    %35 = vector.load %arg2[%c7_22, %c0_23] : memref<8x128xf32, #tpu.memory_space<vmem>>, vector<1x128xf32>
    %36 = vector.broadcast %34 : f32 to vector<1x128xf32>
    %37 = arith.mulf %36, %35 : vector<1x128xf32>
    %38 = arith.addf %33, %37 : vector<1x128xf32>
    %c0_24 = arith.constant 0 : index
    %c0_25 = arith.constant 0 : index
    %39 = vector.load %arg3[%c0_24, %c0_25] : memref<2x128xf32, #tpu.memory_space<vmem>>, vector<1x128xf32>
    tpu.vector_store %arg3[%c0_24, %c0_25], %38 {strides = array<i32>} : memref<2x128xf32, #tpu.memory_space<vmem>>, vector<1x128xf32>,
    %c0_26 = arith.constant 0 : index
    %c1_27 = arith.constant 1 : index
    %40 = memref.load %arg1[%c0_26, %c1_27] : memref<8x2xf32, #tpu.memory_space<smem>>
    %c0_28 = arith.constant 0 : index
    %c0_29 = arith.constant 0 : index
    %41 = vector.load %arg2[%c0_28, %c0_29] : memref<8x128xf32, #tpu.memory_space<vmem>>, vector<1x128xf32>
    %42 = vector.broadcast %40 : f32 to vector<1x128xf32>
    %43 = arith.mulf %42, %41 : vector<1x128xf32>
    %c1_30 = arith.constant 1 : index
    %c1_31 = arith.constant 1 : index
    %44 = memref.load %arg1[%c1_30, %c1_31] : memref<8x2xf32, #tpu.memory_space<smem>>
    %c1_32 = arith.constant 1 : index
    %c0_33 = arith.constant 0 : index
    %45 = vector.load %arg2[%c1_32, %c0_33] : memref<8x128xf32, #tpu.memory_space<vmem>>, vector<1x128xf32>
    %46 = vector.broadcast %44 : f32 to vector<1x128xf32>
    %47 = arith.mulf %46, %45 : vector<1x128xf32>
    %48 = arith.addf %43, %47 : vector<1x128xf32>
    %c2_34 = arith.constant 2 : index
    %c1_35 = arith.constant 1 : index
    %49 = memref.load %arg1[%c2_34, %c1_35] : memref<8x2xf32, #tpu.memory_space<smem>>
    %c2_36 = arith.constant 2 : index
    %c0_37 = arith.constant 0 : index
    %50 = vector.load %arg2[%c2_36, %c0_37] : memref<8x128xf32, #tpu.memory_space<vmem>>, vector<1x128xf32>
    %51 = vector.broadcast %49 : f32 to vector<1x128xf32>
    %52 = arith.mulf %51, %50 : vector<1x128xf32>
    %53 = arith.addf %48, %52 : vector<1x128xf32>
    %c3_38 = arith.constant 3 : index
    %c1_39 = arith.constant 1 : index
    %54 = memref.load %arg1[%c3_38, %c1_39] : memref<8x2xf32, #tpu.memory_space<smem>>
    %c3_40 = arith.constant 3 : index
    %c0_41 = arith.constant 0 : index
    %55 = vector.load %arg2[%c3_40, %c0_41] : memref<8x128xf32, #tpu.memory_space<vmem>>, vector<1x128xf32>
    %56 = vector.broadcast %54 : f32 to vector<1x128xf32>
    %57 = arith.mulf %56, %55 : vector<1x128xf32>
    %58 = arith.addf %53, %57 : vector<1x128xf32>
    %c4_42 = arith.constant 4 : index
    %c1_43 = arith.constant 1 : index
    %59 = memref.load %arg1[%c4_42, %c1_43] : memref<8x2xf32, #tpu.memory_space<smem>>
    %c4_44 = arith.constant 4 : index
    %c0_45 = arith.constant 0 : index
    %60 = vector.load %arg2[%c4_44, %c0_45] : memref<8x128xf32, #tpu.memory_space<vmem>>, vector<1x128xf32>
    %61 = vector.broadcast %59 : f32 to vector<1x128xf32>
    %62 = arith.mulf %61, %60 : vector<1x128xf32>
    %63 = arith.addf %58, %62 : vector<1x128xf32>
    %c5_46 = arith.constant 5 : index
    %c1_47 = arith.constant 1 : index
    %64 = memref.load %arg1[%c5_46, %c1_47] : memref<8x2xf32, #tpu.memory_space<smem>>
    %c5_48 = arith.constant 5 : index
    %c0_49 = arith.constant 0 : index
    %65 = vector.load %arg2[%c5_48, %c0_49] : memref<8x128xf32, #tpu.memory_space<vmem>>, vector<1x128xf32>
    %66 = vector.broadcast %64 : f32 to vector<1x128xf32>
    %67 = arith.mulf %66, %65 : vector<1x128xf32>
    %68 = arith.addf %63, %67 : vector<1x128xf32>
    %c6_50 = arith.constant 6 : index
    %c1_51 = arith.constant 1 : index
    %69 = memref.load %arg1[%c6_50, %c1_51] : memref<8x2xf32, #tpu.memory_space<smem>>
    %c6_52 = arith.constant 6 : index
    %c0_53 = arith.constant 0 : index
    %70 = vector.load %arg2[%c6_52, %c0_53] : memref<8x128xf32, #tpu.memory_space<vmem>>, vector<1x128xf32>
    %71 = vector.broadcast %69 : f32 to vector<1x128xf32>
    %72 = arith.mulf %71, %70 : vector<1x128xf32>
    %73 = arith.addf %68, %72 : vector<1x128xf32>
    %c7_54 = arith.constant 7 : index
    %c1_55 = arith.constant 1 : index
    %74 = memref.load %arg1[%c7_54, %c1_55] : memref<8x2xf32, #tpu.memory_space<smem>>
    %c7_56 = arith.constant 7 : index
    %c0_57 = arith.constant 0 : index
    %75 = vector.load %arg2[%c7_56, %c0_57] : memref<8x128xf32, #tpu.memory_space<vmem>>, vector<1x128xf32>
    %76 = vector.broadcast %74 : f32 to vector<1x128xf32>
    %77 = arith.mulf %76, %75 : vector<1x128xf32>
    %78 = arith.addf %73, %77 : vector<1x128xf32>
    %c1_58 = arith.constant 1 : index
    %c0_59 = arith.constant 0 : index
    %79 = vector.load %arg3[%c1_58, %c0_59] : memref<2x128xf32, #tpu.memory_space<vmem>>, vector<1x128xf32>
    tpu.vector_store %arg3[%c1_58, %c0_59], %78 {strides = array<i32>} : memref<2x128xf32, #tpu.memory_space<vmem>>, vector<1x128xf32>,
    return
  }
  func.func @transform_0(%arg0: i32) -> (i32, i32) {
    %c0_i32 = arith.constant 0 : i32
    %c0_i32_0 = arith.constant 0 : i32
    %c0_i32_1 = arith.constant 0 : i32
    return %c0_i32, %c0_i32_0 : i32, i32
  }
  func.func @transform_1(%arg0: i32) -> (i32, i32) {
    %c0_i32 = arith.constant 0 : i32
    %c0_i32_0 = arith.constant 0 : i32
    return %c0_i32, %arg0 : i32, i32
  }
  func.func @transform_2(%arg0: i32) -> (i32, i32) {
    %c0_i32 = arith.constant 0 : i32
    %c0_i32_0 = arith.constant 0 : i32
    return %c0_i32, %arg0 : i32, i32
  }
}

</mosaic_0001>

<bundles_post_ra>
// kernel: tpu_custom_call.1
= control target key start
LH: loop header
LB: loop body
LE: loop exit
PB: predicated region body
PF: predicated region fallthrough
CT: control target
= control target key end

     0   :  { %7 = vsyncpa [#allocation4], 0  ;;  %s291_s0 = inlined_call_operand.vmem [shape: f32[8,2], index: 0, kind: input, shape index: {}]   ;;  %s292_s1 = inlined_call_operand.vmem [shape: f32[8,128], index: 1, kind: input, shape index: {}]   ;;  %s293_s2 = inlined_call_operand.hbm [shape: f32[2,128], index: 2, kind: output, shape index: {}]  }
   0x1   :  { %8 = vsyncpa [#allocation3], 0  ;;  %s15_s11 = sshll.u32 %s291_s0, 4  ;;  %s16_s11 = int_to_ptr.vmem [resolvable:$true] %s15_s11 }
   0x2   :  { %s137_s12 = scalar_lea.vmem %s16_s11, 128  ;;  %p142_p1 = scmp.lt.s32.totalorder %s16_s11, %s16_s11 }
   0x3   :  { %p138_p0 = scmp.ne.s32.totalorder %s16_s11, %s137_s12  ;;  %p143_p2 = scmp.lt.s32.totalorder %s137_s12, %s137_s12 }
   0x5   :  { %p144_p3 = por %p143_p2, %p142_p1 }
   0x7   :  { %p145_p4 = pnand %p144_p3, %p138_p0 }
   0x9   :  { %148 = shalt.err (!%p145_p4)
}
   0xa   :  { %s175_s13 = smov [#allocation2]  }
   0xb   :  { %18 = dma.vmem_to_smem %s16_s11, 128, %s175_s13, [#allocation4]  }
   0xc   :  { %171 = dma.done.wait [#allocation4], 128  }
   0xd   :  { %172 = vsyncadd [#allocation4], 4294967168 }
   0xe   :  { %24 = sfence }
   0xf   :  { %s25_s14 = sld [smem:[#allocation2]]  ;;  %v26_v0 = vld [vmem:[%s292_s1] sm:$0x1]  ;;  %v30_v1 = vld [vmem:[%s292_s1 + $0x1] sm:$0x1]  ;;  %s212_s27 = sld [smem:[#allocation2 + $0x1]] }
  0x10   :  { %s120_s15 = sld [smem:[#allocation2 + $0x80]]  ;;  %v35_v2 = vld [vmem:[%s292_s1 + $0x2] sm:$0x1]  ;;  %v40_v5 = vld [vmem:[%s292_s1 + $0x3] sm:$0x1]  ;;  %s217_s30 = sld [smem:[#allocation2 + $0x81]] }
  0x11   :  { %s121_s16 = sld [smem:[#allocation2 + $0x100]]  ;;  %s219_s3 = sld [smem:[#allocation2 + $0x101]]  ;;  %v45_v9 = vld [vmem:[%s292_s1 + $0x4] sm:$0x1]  ;;  %v50_v13 = vld [vmem:[%s292_s1 + $0x5] sm:$0x1] }
  0x12   :  { %s122_s17 = sld [smem:[#allocation2 + $0x180]]  ;;  %s224_s6 = sld [smem:[#allocation2 + $0x181]]  ;;  %v66_v17 = vld [vmem:[%s292_s1] sm:$0x1]  ;;  %v70_v18 = vld [vmem:[%s292_s1 + $0x1] sm:$0x1] }
  0x13   :  { %s195_s18 = sld [smem:[#allocation2 + $0x200]]  ;;  %s230_s9 = sld [smem:[#allocation2 + $0x201]]  ;;  %v75_v19 = vld [vmem:[%s292_s1 + $0x2] sm:$0x1]  ;;  %v55_v23 = vld [vmem:[%s292_s1 + $0x6] sm:$0x1] }
  0x14   :  { %s197_s0 = sld [smem:[#allocation2 + $0x280]]  ;;  %s232_s10 = sld [smem:[#allocation2 + $0x281]]  ;;  %v80_v29 = vld [vmem:[%s292_s1 + $0x3] sm:$0x1]  ;;  %v60_v34 = vld [vmem:[%s292_s1 + $0x7] sm:$0x1] }
  0x15   :  { %s205_s23 = sld [smem:[#allocation2 + $0x300]]  ;;  %v27_v3 = vstv %s25_s14  ;;  %v67_v24 = vstv %s212_s27  ;;  %s256_s21 = sld [smem:[#allocation2 + $0x381]]  ;;  %v85_v36 = vld [vmem:[%s292_s1 + $0x4] sm:$0x1]  ;;  %v90_v42 = vld [vmem:[%s292_s1 + $0x5] sm:$0x1] }
  0x16   :  { %s210_s26 = sld [smem:[#allocation2 + $0x380]]  ;;  %v31_v4 = vstv %s120_s15  ;;  %v28_v6 = vmul.f32 %v27_v3, %v26_v0  ;;  %v68_v26 = vmul.f32 %v67_v24, %v66_v17  ;;  %v71_v27 = vstv %s217_s30  ;;  %v95_v48 = vld [vmem:[%s292_s1 + $0x6] sm:$0x1]  ;;  %v100_v53 = vld [vmem:[%s292_s1 + $0x7] sm:$0x1]  ;;  %s176_s4 = smov [#allocation5]  }
  0x17   :  { %v32_v7 = vmul.f32 %v31_v4, %v30_v1  ;;  %v36_v8 = vstv %s121_s16  ;;  %v76_v28 = vstv %s219_s3  ;;  %v72_v31 = vmul.f32 %v71_v27, %v70_v18  ;;  %s111_s5 = sshll.u32 %s176_s4, 4  ;;  %s112_s5 = int_to_ptr.vmem [resolvable:$true] %s111_s5 }
  0x18   :  { %v37_v10 = vmul.f32 %v36_v8, %v35_v2  ;;  %v41_v11 = vstv %s122_s17  ;;  %s244_s17 = sld [smem:[#allocation2 + $0x301]]  ;;  %v77_v32 = vmul.f32 %v76_v28, %v75_v19  ;;  %v81_v33 = vstv %s224_s6  ;;  %s149_s6 = scalar_lea.vmem %s112_s5, 32 }
  0x19   :  { %v46_v12 = vstv %s195_s18  ;;  %v33_v14 = vadd.f32 %v32_v7, %v28_v6  ;;  %v42_v15 = vmul.f32 %v41_v11, %v40_v5  ;;  %v86_v37 = vstv %s230_s9  ;;  %p150_p5 = scmp.ne.s32.totalorder %s112_s5, %s149_s6  ;;  %p154_p6 = scmp.lt.s32.totalorder %s112_s5, %s112_s5 }
  0x1a   :  { %v51_v16 = vstv %s197_s0  ;;  %v47_v21 = vmul.f32 %v46_v12, %v45_v9  ;;  %v73_v40 = vadd.f32 %v72_v31, %v68_v26  ;;  %v82_v41 = vmul.f32 %v81_v33, %v80_v29  ;;  %p155_p7 = scmp.lt.s32.totalorder %s149_s6, %s149_s6 }
  0x1b   :  { %v38_v20 = vadd.f32 %v37_v10, %v33_v14  ;;  %v52_v22 = vmul.f32 %v51_v16, %v50_v13  ;;  %v56_v25 = vstv %s205_s23  ;;  %v91_v43 = vstv %s232_s10 }
  0x1c   :  { %v61_v35 = vstv %s210_s26  ;;  %v57_v39 = vmul.f32 %v56_v25, %v55_v23  ;;  %v78_v46 = vadd.f32 %v77_v32, %v73_v40  ;;  %v87_v47 = vmul.f32 %v86_v37, %v85_v36  ;;  %p156_p8 = por %p155_p7, %p154_p6 }
  0x1d   :  { %v43_v30 = vadd.f32 %v42_v15, %v38_v20  ;;  %v62_v45 = vmul.f32 %v61_v35, %v60_v34  ;;  %v92_v52 = vmul.f32 %v91_v43, %v90_v42  ;;  %v101_v54 = vstv %s256_s21 }
  0x1e   :  { %v96_v49 = vstv %s244_s17  ;;  %v83_v51 = vadd.f32 %v82_v41, %v78_v46  ;;  %v102_v59 = vmul.f32 %v101_v54, %v100_v53  ;;  %p157_p9 = pnand %p156_p8, %p150_p5 }
  0x1f   :  { %v48_v38 = vadd.f32 %v47_v21, %v43_v30  ;;  %v97_v57 = vmul.f32 %v96_v49, %v95_v48 }
  0x20   :  { %v88_v56 = vadd.f32 %v87_v47, %v83_v51 }
  0x21   :  { %v53_v44 = vadd.f32 %v52_v22, %v48_v38 }
  0x22   :  { %v93_v58 = vadd.f32 %v92_v52, %v88_v56 }
  0x23   :  { %v58_v50 = vadd.f32 %v57_v39, %v53_v44 }
  0x24   :  { %v98_v60 = vadd.f32 %v97_v57, %v93_v58 }
  0x25   :  { %v63_v55 = vadd.f32 %v62_v45, %v58_v50 }
  0x26   :  { %v103_v61 = vadd.f32 %v102_v59, %v98_v60 }
  0x27   :  { %64 = vst [vmem:[#allocation5] sm:$0x1] %v63_v55 }
  0x28   :  { %104 = vst [vmem:[#allocation5 + $0x1] sm:$0x1] %v103_v61 }
  0x29   :  { %160 = shalt.err (!%p157_p9)
}
  0x2a   :  { %s161_s8 = scalar_lea.hbm %s293_s2, 32 }
  0x2b   :  { %p162_p10 = scmp.ne.s32.totalorder %s293_s2, %s161_s8  ;;  %p165_p11 = scmp.lt.u32.totalorder %s161_s8, %s293_s2 }
  0x2d   :  { %p167_p12 = pnand %p165_p11, %p162_p10 }
  0x2f   :  { %170 = shalt.err (!%p167_p12)
}
  0x30   :  { %114 = dma.vmem_to_hbm [thread:$0]  %s112_s5, 32, %s293_s2, [#allocation3]  }
  0x31   :  { %173 = dma.done.wait [#allocation3], 32  }
  0x32   :  { %174 = vsyncadd [#allocation3], 4294967264 }
  0x33   :  { %118 = vsyncpa [#allocation3], 1 }
  0x34   :  { %119 = vsyncpa [#allocation4], 1 }

</bundles_post_ra>
